<compile_context>
chip_gen: v7x
topology: tpu7x:2x2x1
jax: 0.10.0
libtpu: 0.0.40
codegen_flags: <defaults>
</compile_context>

<pallas_src>
import numpy as np
import jax
import jax.numpy as jnp
from jax.experimental import pallas as pl
from jax.experimental.pallas import tpu as pltpu

NUM_JOINTS = 23
EMBED = 69                 # 3 * NUM_JOINTS
WIDTH = 128
LANE = 128
SLAB_ROWS = 2 * LANE + 8   # 264: [W-block rows | fused-fc_pose rows | bias rows]
SLAB_COLS = 3 * LANE       # 384
M_ROW = LANE               # row offset of the fused fc_pose matrix
B_ROW = 2 * LANE           # row holding the three MLP biases


def immediate_parent_to_all_ancestors(
    immediate_parents=(-1, 0, 0, 0, 1, 2, 3, 4, 5, 6, 7, 8, 9, 9, 9, 12, 13, 14,
                       16, 17, 18, 19, 20, 21)):
    anc = {j: [] for j in range(len(immediate_parents) - 1)}
    for i in range(1, len(immediate_parents)):
        joint = i - 1
        ip = immediate_parents[i] - 1
        if ip >= 0:
            anc[joint] = [ip] + anc[ip]
    return anc


def autoregression_kernel(feat_ref, slab_ref, rs_ref):
    x = feat_ref[...]                              # (1, 128); lanes 72: are zero

    # Aligned views into the single weight slab (row offsets multiples of 8,
    # column offsets multiples of 128 -> free slices, no realignment copies).
    w1 = slab_ref[0:128, 0:128]                    # rows 3:72 hold Linear(69,128)
    w2 = slab_ref[0:128, 128:256]                  # Linear(128,128)
    w3 = slab_ref[0:128, 256:384]                  # Linear(128,69), cols 69: zero
    mcat = slab_ref[128:256, :]                    # (128, 384) fused fc_pose map
    b1 = slab_ref[256:257, 0:128]
    b2 = slab_ref[256:257, 128:256]
    b3 = slab_ref[256:257, 256:384]                # cols 69: zero

    # block_mlps: Linear + ReLU + Linear + ReLU + Linear
    h = jnp.maximum(jnp.dot(x, w1, preferred_element_type=jnp.float32) + b1, 0.0)
    h = jnp.maximum(jnp.dot(h, w2, preferred_element_type=jnp.float32) + b2, 0.0)
    jf = jnp.dot(h, w3, preferred_element_type=jnp.float32) + b3   # (1,128); lanes 69: zero

    # Per-joint autoregressive fc_pose folded into ONE (128 -> 384) matmul.
    # fc_pose biases are exactly zero -> no bias input / add.
    a = jnp.dot(jf, mcat, preferred_element_type=jnp.float32)      # (1, 384)
    a0 = a[:, 0:128]      # x-component of every joint (lanes 0:23 valid)
    a1 = a[:, 128:256]    # y-component
    a2 = a[:, 256:384]    # z-component

    # Rodrigues formula (reference: theta = sqrt(1e-5 + |rvec|^2)).
    # rsqrt + multiplies instead of sqrt + three divides.
    t2 = 1e-5 + a0 * a0 + a1 * a1 + a2 * a2
    inv = jax.lax.rsqrt(t2)
    theta = t2 * inv                               # == sqrt(t2)
    r0 = a0 * inv
    r1 = a1 * inv
    r2 = a2 * inv
    c = jnp.cos(theta)
    s = jnp.sin(theta)
    omc = 1.0 - c
    r01 = r0 * r1 * omc
    r02 = r0 * r2 * omc
    r12 = r1 * r2 * omc
    r0s = r0 * s
    r1s = r1 * s
    r2s = r2 * s

    # Nine direct lane-dense (1,128) row stores; row k = rotation-matrix entry k.
    rs_ref[0:1, :] = r0 * r0 + (1.0 - r0 * r0) * c
    rs_ref[1:2, :] = r01 - r2s
    rs_ref[2:3, :] = r02 + r1s
    rs_ref[3:4, :] = r01 + r2s
    rs_ref[4:5, :] = r1 * r1 + (1.0 - r1 * r1) * c
    rs_ref[5:6, :] = r12 - r0s
    rs_ref[6:7, :] = r02 - r1s
    rs_ref[7:8, :] = r12 + r0s
    rs_ref[8:9, :] = r2 * r2 + (1.0 - r2 * r2) * c


def init_params(key):
    """Deterministic synthetic parameters, packed into one lane-aligned slab."""
    ks = jax.random.split(key, 3)

    def lin(k, fan_in, fan_out):
        bound = 1.0 / np.sqrt(fan_in)
        kw, kb = jax.random.split(k)
        w = jax.random.uniform(kw, (fan_in, fan_out), jnp.float32, -bound, bound)
        b = jax.random.uniform(kb, (fan_out,), jnp.float32, -bound, bound)
        return np.asarray(w), np.asarray(b)

    w1, b1 = lin(ks[0], EMBED, WIDTH)
    w2, b2 = lin(ks[1], WIDTH, WIDTH)
    w3, b3 = lin(ks[2], WIDTH, 3 * NUM_JOINTS)

    # fc_pose: one Linear(3 + 3*num_parents, 3) per joint, uniform(-1e-5, 1e-5),
    # zero bias.  Fold exactly (by zero-padding) into a single (69, 69) matrix M
    # with auto = M @ joint_F.
    parents_dict = immediate_parent_to_all_ancestors()
    init_val = 1e-5
    rng = np.random.RandomState(0)
    M = np.zeros((EMBED, EMBED), np.float32)
    for j in range(NUM_JOINTS):
        pj = parents_dict[j]
        in_dim = 3 + 3 * len(pj)
        Wj = rng.uniform(-init_val, init_val, size=(3, in_dim)).astype(np.float32)
        M[3 * j:3 * j + 3, 3 * j:3 * j + 3] = Wj[:, 0:3]          # own embedding
        for k, p in enumerate(pj):                                # ancestor embeddings
            M[3 * j:3 * j + 3, 3 * p:3 * p + 3] = Wj[:, 3 * (k + 1):3 * (k + 1) + 3]

    m0t = M[0::3, :].T   # (69, 23): x-component rows of M, as (in, out)
    m1t = M[1::3, :].T
    m2t = M[2::3, :].T

    # Single zero-padded slab: one contiguous DMA, all views (8,128)-aligned.
    slab = np.zeros((SLAB_ROWS, SLAB_COLS), np.float32)
    slab[3:3 + EMBED, 0:WIDTH] = w1                  # folds the feature[:, 3:] offset
    slab[0:WIDTH, WIDTH:2 * WIDTH] = w2
    slab[0:WIDTH, 2 * WIDTH:2 * WIDTH + 3 * NUM_JOINTS] = w3
    slab[M_ROW:M_ROW + EMBED, 0:NUM_JOINTS] = m0t
    slab[M_ROW:M_ROW + EMBED, WIDTH:WIDTH + NUM_JOINTS] = m1t
    slab[M_ROW:M_ROW + EMBED, 2 * WIDTH:2 * WIDTH + NUM_JOINTS] = m2t
    slab[B_ROW, 0:WIDTH] = b1
    slab[B_ROW, WIDTH:2 * WIDTH] = b2
    slab[B_ROW, 2 * WIDTH:2 * WIDTH + 3 * NUM_JOINTS] = b3
    return dict(slab=jnp.asarray(slab))


def autoregression_forward(feature, params):
    """feature: (1, 72) float32.  Returns dict {Rs, pose_U, pose_S, pose_V}."""
    # Pad the feature row to 128 lanes; the [:, 3:] slice is baked into the slab.
    feat_pad = jnp.zeros((1, LANE), jnp.float32).at[:, :feature.shape[1]].set(feature)

    vmem_spec = pl.BlockSpec(memory_space=pltpu.MemorySpace.VMEM)
    rs_slab = pl.pallas_call(
        autoregression_kernel,
        out_shape=jax.ShapeDtypeStruct((9, LANE), jnp.float32),
        in_specs=[vmem_spec, vmem_spec],
        out_specs=vmem_spec,
    )(feat_pad, params["slab"])                                   # (9, 128)

    Rs = rs_slab[:, :NUM_JOINTS].T.reshape(NUM_JOINTS, 3, 3)      # (23, 3, 3)

    # torch.svd returns (U, S, V) with A = U diag(S) V^T; jnp returns (U, S, Vh).
    U, S, Vh = jnp.linalg.svd(Rs, full_matrices=False)
    V = jnp.swapaxes(Vh, -1, -2)
    return {"Rs": Rs, "pose_U": U, "pose_S": S, "pose_V": V}


if __name__ == "__main__":
    key = jax.random.PRNGKey(0)
    k_feat, k_param = jax.random.split(key)

    feature = jax.random.normal(k_feat, (1, 72), dtype=jnp.float32)  # batch=1, 72-dim pose feature
    params = init_params(k_param)

    out = autoregression_forward(feature, params)
    jax.block_until_ready(out)

    assert out["Rs"].shape == (23, 3, 3)
    assert out["pose_U"].shape == (23, 3, 3)
    assert out["pose_S"].shape == (23, 3)
    assert out["pose_V"].shape == (23, 3, 3)
    print("KERNEL_OK")
</pallas_src>

<mosaic_0001>
module attributes {stable_mosaic.version = 11 : i64} {
  func.func @autoregression_kernel(%arg0: memref<1x128xf32, #tpu.memory_space<vmem>>, %arg1: memref<264x384xf32, #tpu.memory_space<vmem>>, %arg2: memref<9x128xf32, #tpu.memory_space<vmem>>) attributes {dimension_semantics = [], scalar_prefetch = 0 : i64, scratch_operands = 0 : i64, tpu.core_type = #tpu.core_type<tc>} {
    %c0 = arith.constant 0 : index
    %c0_0 = arith.constant 0 : index
    %0 = vector.load %arg0[%c0, %c0_0] : memref<1x128xf32, #tpu.memory_space<vmem>>, vector<1x128xf32>
    %c0_1 = arith.constant 0 : index
    %c0_2 = arith.constant 0 : index
    %1 = vector.load %arg1[%c0_1, %c0_2] : memref<264x384xf32, #tpu.memory_space<vmem>>, vector<128x128xf32>
    %c0_3 = arith.constant 0 : index
    %c128 = arith.constant 128 : index
    %2 = vector.load %arg1[%c0_3, %c128] : memref<264x384xf32, #tpu.memory_space<vmem>>, vector<128x128xf32>
    %c0_4 = arith.constant 0 : index
    %c256 = arith.constant 256 : index
    %3 = vector.load %arg1[%c0_4, %c256] : memref<264x384xf32, #tpu.memory_space<vmem>>, vector<128x128xf32>
    %c128_5 = arith.constant 128 : index
    %c0_6 = arith.constant 0 : index
    %4 = vector.load %arg1[%c128_5, %c0_6] : memref<264x384xf32, #tpu.memory_space<vmem>>, vector<128x384xf32>
    %c256_7 = arith.constant 256 : index
    %c0_8 = arith.constant 0 : index
    %5 = vector.load %arg1[%c256_7, %c0_8] : memref<264x384xf32, #tpu.memory_space<vmem>>, vector<1x128xf32>
    %c256_9 = arith.constant 256 : index
    %c128_10 = arith.constant 128 : index
    %6 = vector.load %arg1[%c256_9, %c128_10] : memref<264x384xf32, #tpu.memory_space<vmem>>, vector<1x128xf32>
    %c256_11 = arith.constant 256 : index
    %c256_12 = arith.constant 256 : index
    %7 = vector.load %arg1[%c256_11, %c256_12] : memref<264x384xf32, #tpu.memory_space<vmem>>, vector<1x128xf32>
    %cst = arith.constant dense<0.000000e+00> : vector<1x128xf32>
    %8 = tpu.matmul %0, %1, %cst {dimension_numbers = #tpu.dot_dimension_numbers<[1], [0], [0], [1], [0, 0, 1, 1], [], []>} : vector<1x128xf32>, vector<128x128xf32>, vector<1x128xf32> -> vector<1x128xf32>
    %9 = arith.addf %8, %5 : vector<1x128xf32>
    %cst_13 = arith.constant 0.000000e+00 : f32
    %10 = vector.broadcast %cst_13 : f32 to vector<1x128xf32>
    %11 = arith.maximumf %9, %10 : vector<1x128xf32>
    %cst_14 = arith.constant dense<0.000000e+00> : vector<1x128xf32>
    %12 = tpu.matmul %11, %2, %cst_14 {dimension_numbers = #tpu.dot_dimension_numbers<[1], [0], [0], [1], [0, 0, 1, 1], [], []>} : vector<1x128xf32>, vector<128x128xf32>, vector<1x128xf32> -> vector<1x128xf32>
    %13 = arith.addf %12, %6 : vector<1x128xf32>
    %cst_15 = arith.constant 0.000000e+00 : f32
    %14 = vector.broadcast %cst_15 : f32 to vector<1x128xf32>
    %15 = arith.maximumf %13, %14 : vector<1x128xf32>
    %cst_16 = arith.constant dense<0.000000e+00> : vector<1x128xf32>
    %16 = tpu.matmul %15, %3, %cst_16 {dimension_numbers = #tpu.dot_dimension_numbers<[1], [0], [0], [1], [0, 0, 1, 1], [], []>} : vector<1x128xf32>, vector<128x128xf32>, vector<1x128xf32> -> vector<1x128xf32>
    %17 = arith.addf %16, %7 : vector<1x128xf32>
    %cst_17 = arith.constant dense<0.000000e+00> : vector<1x384xf32>
    %18 = tpu.matmul %17, %4, %cst_17 {dimension_numbers = #tpu.dot_dimension_numbers<[1], [0], [0], [1], [0, 0, 1, 1], [], []>} : vector<1x128xf32>, vector<128x384xf32>, vector<1x384xf32> -> vector<1x384xf32>
    %19 = vector.extract_strided_slice %18 {offsets = [0, 0], sizes = [1, 128], strides = [1, 1]} : vector<1x384xf32> to vector<1x128xf32>
    %20 = vector.extract_strided_slice %18 {offsets = [0, 128], sizes = [1, 128], strides = [1, 1]} : vector<1x384xf32> to vector<1x128xf32>
    %21 = vector.extract_strided_slice %18 {offsets = [0, 256], sizes = [1, 128], strides = [1, 1]} : vector<1x384xf32> to vector<1x128xf32>
    %22 = arith.mulf %19, %19 : vector<1x128xf32>
    %cst_18 = arith.constant 9.99999974E-6 : f32
    %23 = vector.broadcast %cst_18 : f32 to vector<1x128xf32>
    %24 = arith.addf %23, %22 : vector<1x128xf32>
    %25 = arith.mulf %20, %20 : vector<1x128xf32>
    %26 = arith.addf %24, %25 : vector<1x128xf32>
    %27 = arith.mulf %21, %21 : vector<1x128xf32>
    %28 = arith.addf %26, %27 : vector<1x128xf32>
    %29 = math.rsqrt %28 : vector<1x128xf32>
    %30 = arith.mulf %28, %29 : vector<1x128xf32>
    %31 = arith.mulf %19, %29 : vector<1x128xf32>
    %32 = arith.mulf %20, %29 : vector<1x128xf32>
    %33 = arith.mulf %21, %29 : vector<1x128xf32>
    %34 = math.cos %30 : vector<1x128xf32>
    %35 = math.sin %30 : vector<1x128xf32>
    %cst_19 = arith.constant 1.000000e+00 : f32
    %36 = vector.broadcast %cst_19 : f32 to vector<1x128xf32>
    %37 = arith.subf %36, %34 : vector<1x128xf32>
    %38 = arith.mulf %31, %32 : vector<1x128xf32>
    %39 = arith.mulf %38, %37 : vector<1x128xf32>
    %40 = arith.mulf %31, %33 : vector<1x128xf32>
    %41 = arith.mulf %40, %37 : vector<1x128xf32>
    %42 = arith.mulf %32, %33 : vector<1x128xf32>
    %43 = arith.mulf %42, %37 : vector<1x128xf32>
    %44 = arith.mulf %31, %35 : vector<1x128xf32>
    %45 = arith.mulf %32, %35 : vector<1x128xf32>
    %46 = arith.mulf %33, %35 : vector<1x128xf32>
    %47 = arith.mulf %31, %31 : vector<1x128xf32>
    %48 = arith.mulf %31, %31 : vector<1x128xf32>
    %cst_20 = arith.constant 1.000000e+00 : f32
    %49 = vector.broadcast %cst_20 : f32 to vector<1x128xf32>
    %50 = arith.subf %49, %48 : vector<1x128xf32>
    %51 = arith.mulf %50, %34 : vector<1x128xf32>
    %52 = arith.addf %47, %51 : vector<1x128xf32>
    %c0_21 = arith.constant 0 : index
    %c0_22 = arith.constant 0 : index
    %53 = vector.load %arg2[%c0_21, %c0_22] : memref<9x128xf32, #tpu.memory_space<vmem>>, vector<1x128xf32>
    tpu.vector_store %arg2[%c0_21, %c0_22], %52 {strides = array<i32>} : memref<9x128xf32, #tpu.memory_space<vmem>>, vector<1x128xf32>,
    %54 = arith.subf %39, %46 : vector<1x128xf32>
    %c1 = arith.constant 1 : index
    %c0_23 = arith.constant 0 : index
    %55 = vector.load %arg2[%c1, %c0_23] : memref<9x128xf32, #tpu.memory_space<vmem>>, vector<1x128xf32>
    tpu.vector_store %arg2[%c1, %c0_23], %54 {strides = array<i32>} : memref<9x128xf32, #tpu.memory_space<vmem>>, vector<1x128xf32>,
    %56 = arith.addf %41, %45 : vector<1x128xf32>
    %c2 = arith.constant 2 : index
    %c0_24 = arith.constant 0 : index
    %57 = vector.load %arg2[%c2, %c0_24] : memref<9x128xf32, #tpu.memory_space<vmem>>, vector<1x128xf32>
    tpu.vector_store %arg2[%c2, %c0_24], %56 {strides = array<i32>} : memref<9x128xf32, #tpu.memory_space<vmem>>, vector<1x128xf32>,
    %58 = arith.addf %39, %46 : vector<1x128xf32>
    %c3 = arith.constant 3 : index
    %c0_25 = arith.constant 0 : index
    %59 = vector.load %arg2[%c3, %c0_25] : memref<9x128xf32, #tpu.memory_space<vmem>>, vector<1x128xf32>
    tpu.vector_store %arg2[%c3, %c0_25], %58 {strides = array<i32>} : memref<9x128xf32, #tpu.memory_space<vmem>>, vector<1x128xf32>,
    %60 = arith.mulf %32, %32 : vector<1x128xf32>
    %61 = arith.mulf %32, %32 : vector<1x128xf32>
    %cst_26 = arith.constant 1.000000e+00 : f32
    %62 = vector.broadcast %cst_26 : f32 to vector<1x128xf32>
    %63 = arith.subf %62, %61 : vector<1x128xf32>
    %64 = arith.mulf %63, %34 : vector<1x128xf32>
    %65 = arith.addf %60, %64 : vector<1x128xf32>
    %c4 = arith.constant 4 : index
    %c0_27 = arith.constant 0 : index
    %66 = vector.load %arg2[%c4, %c0_27] : memref<9x128xf32, #tpu.memory_space<vmem>>, vector<1x128xf32>
    tpu.vector_store %arg2[%c4, %c0_27], %65 {strides = array<i32>} : memref<9x128xf32, #tpu.memory_space<vmem>>, vector<1x128xf32>,
    %67 = arith.subf %43, %44 : vector<1x128xf32>
    %c5 = arith.constant 5 : index
    %c0_28 = arith.constant 0 : index
    %68 = vector.load %arg2[%c5, %c0_28] : memref<9x128xf32, #tpu.memory_space<vmem>>, vector<1x128xf32>
    tpu.vector_store %arg2[%c5, %c0_28], %67 {strides = array<i32>} : memref<9x128xf32, #tpu.memory_space<vmem>>, vector<1x128xf32>,
    %69 = arith.subf %41, %45 : vector<1x128xf32>
    %c6 = arith.constant 6 : index
    %c0_29 = arith.constant 0 : index
    %70 = vector.load %arg2[%c6, %c0_29] : memref<9x128xf32, #tpu.memory_space<vmem>>, vector<1x128xf32>
    tpu.vector_store %arg2[%c6, %c0_29], %69 {strides = array<i32>} : memref<9x128xf32, #tpu.memory_space<vmem>>, vector<1x128xf32>,
    %71 = arith.addf %43, %44 : vector<1x128xf32>
    %c7 = arith.constant 7 : index
    %c0_30 = arith.constant 0 : index
    %72 = vector.load %arg2[%c7, %c0_30] : memref<9x128xf32, #tpu.memory_space<vmem>>, vector<1x128xf32>
    tpu.vector_store %arg2[%c7, %c0_30], %71 {strides = array<i32>} : memref<9x128xf32, #tpu.memory_space<vmem>>, vector<1x128xf32>,
    %73 = arith.mulf %33, %33 : vector<1x128xf32>
    %74 = arith.mulf %33, %33 : vector<1x128xf32>
    %cst_31 = arith.constant 1.000000e+00 : f32
    %75 = vector.broadcast %cst_31 : f32 to vector<1x128xf32>
    %76 = arith.subf %75, %74 : vector<1x128xf32>
    %77 = arith.mulf %76, %34 : vector<1x128xf32>
    %78 = arith.addf %73, %77 : vector<1x128xf32>
    %c8 = arith.constant 8 : index
    %c0_32 = arith.constant 0 : index
    %79 = vector.load %arg2[%c8, %c0_32] : memref<9x128xf32, #tpu.memory_space<vmem>>, vector<1x128xf32>
    tpu.vector_store %arg2[%c8, %c0_32], %78 {strides = array<i32>} : memref<9x128xf32, #tpu.memory_space<vmem>>, vector<1x128xf32>,
    return
  }
}

</mosaic_0001>

<bundles_post_ra>
// kernel: tpu_custom_call.1
= control target key start
LH: loop header
LB: loop body
LE: loop exit
PB: predicated region body
PF: predicated region fallthrough
CT: control target
= control target key end

     0   :  { %7 = vsyncpa [#allocation3], 0  ;;  %s1379_s0 = inlined_call_operand.hbm [shape: f32[1,128], index: 0, kind: input, shape index: {}]   ;;  %s1380_s1 = inlined_call_operand.hbm [shape: f32[264,384], index: 1, kind: input, shape index: {}]   ;;  %s1381_s2 = inlined_call_operand.hbm [shape: f32[9,128], index: 2, kind: output, shape index: {}]  }
   0x1   :  { %8 = vsyncpa [#allocation6], 0 }
   0x2   :  { %9 = vsyncpa [#allocation4], 0  ;;  %s1206_s9 = smov [#allocation2]   ;;  %s1207_s11 = smov [#allocation5]  }
   0x3   :  { %s16_s10 = sshll.u32 %s1206_s9, 4  ;;  %s25_s12 = sshll.u32 %s1207_s11, 4  ;;  %s17_s10 = int_to_ptr.vmem [resolvable:$true] %s16_s10  ;;  %s1237_s12 = int_to_ptr.vmem [resolvable:$true] %s25_s12 }
   0x4   :  { %s1134_s15 = scalar_lea.hbm %s1379_s0, 16 }
   0x5   :  { %p1135_p0 = scmp.ne.s32.totalorder %s1379_s0, %s1134_s15  ;;  %p1138_p1 = scmp.lt.u32.totalorder %s1134_s15, %s1379_s0 }
   0x7   :  { %p1140_p2 = pnand %p1138_p1, %p1135_p0 }
   0x9   :  { %1143 = shalt.err (!%p1140_p2)
}
   0xa   :  { %s1144_s20 = scalar_lea.vmem %s17_s10, 16  ;;  %s1148_s21 = scalar_lea.vmem %s17_s10, 32 }
   0xb   :  { %p1145_p3 = scmp.ne.s32.totalorder %s17_s10, %s1144_s20  ;;  %p1149_p4 = scmp.lt.s32.totalorder %s17_s10, %s17_s10 }
   0xc   :  { %p1150_p5 = scmp.lt.s32.totalorder %s1148_s21, %s1144_s20 }
   0xe   :  { %p1151_p6 = por %p1150_p5, %p1149_p4 }
  0x10   :  { %p1152_p7 = pnand %p1151_p6, %p1145_p3 }
  0x12   :  { %1155 = shalt.err (!%p1152_p7)
}
  0x13   :  { %19 = dma.hbm_to_vmem [thread:$0]  %s1379_s0, 16, %s17_s10, [#allocation3]  }
  0x14   :  { %s1156_s26 = scalar_lea.hbm %s1380_s1, 12672 }
  0x15   :  { %p1157_p8 = scmp.ne.s32.totalorder %s1380_s1, %s1156_s26  ;;  %p1160_p9 = scmp.lt.u32.totalorder %s1156_s26, %s1380_s1 }
  0x17   :  { %p1162_p10 = pnand %p1160_p9, %p1157_p8 }
  0x19   :  { %1165 = shalt.err (!%p1162_p10)
}
  0x1a   :  { %s1166_s3 = scalar_lea.vmem %s1237_s12, 12672  ;;  %p1171_p12 = scmp.lt.s32.totalorder %s1237_s12, %s1237_s12 }
  0x1b   :  { %p1167_p11 = scmp.ne.s32.totalorder %s1237_s12, %s1166_s3  ;;  %p1172_p13 = scmp.lt.s32.totalorder %s1166_s3, %s1166_s3 }
  0x1d   :  { %p1173_p0 = por %p1172_p13, %p1171_p12 }
  0x1f   :  { %p1174_p1 = pnand %p1173_p0, %p1167_p11 }
  0x21   :  { %1177 = shalt.err (!%p1174_p1)
}
  0x22   :  { %s1208_s0 = smov 384   ;;  %s1209_s4 = smov 24  }
  0x23   :  { %31 = dma.hbm_to_vmem [thread:$0]  %s1380_s1, 12672, %s1237_s12, [#allocation6], %s1208_s0, %s1208_s0, %s1209_s4  }
  0x24   :  { %1200 = dma.done.wait [#allocation3], 16  }
  0x25   :  { %1201 = vsyncadd [#allocation3], 4294967280 }
  0x26   :  { %1202 = dma.done.wait [#allocation6], 12672  }
  0x27   :  { %1203 = vsyncadd [#allocation6], 4294954624  ;;  %v1210_v0 = vmov 0.0|0.0   ;;  %vm1211_vm0 = vmmov 0   ;;  %v1212_v1 = vmov 0.0   ;;  %v39_v2 = vld [vmem:[#allocation5] sm:$0xff] }
  0x28   :  { %980 = vmatprep.subr.bf16.mxu0 %v1210_v0  ;;  %872 = vmatprep.mubr.msk.f32.mxu0 %vm1211_vm0, %v1212_v1  ;;  %v40_v3 = vld [vmem:[#allocation5 + $0x18] sm:$0xff]  ;;  %v41_v4 = vld [vmem:[#allocation5 + $0x30] sm:$0xff]  ;;  %v42_v6 = vld [vmem:[#allocation5 + $0x48] sm:$0xff]  ;;  %s1219_s1 = smov [#allocation7]  }
  0x29   :  { %1004 = vmatprep.subr.bf16.mxu1 %v1210_v0  ;;  %907 = vmatprep.mubr.msk.f32.mxu1 %vm1211_vm0, %v1212_v1  ;;  %v981_v5 = vpack.c.bf16 %v40_v3, %v39_v2  ;;  %v984_v7 = vpack.c.bf16 %v42_v6, %v41_v4  ;;  %v43_v8 = vld [vmem:[#allocation5 + $0x60] sm:$0xff]  ;;  %v44_v9 = vld [vmem:[#allocation5 + $0x78] sm:$0xff]  ;;  %v55_v10 = vld [vmem:[#allocation5 + $0x8] sm:$0xff]  ;;  %s751_s7 = sshll.u32 %s1219_s1, 4  ;;  %s1360_s7 = int_to_ptr.vmem [resolvable:$true] %s751_s7 }
  0x2a   :  { %v56_v11 = vld [vmem:[#allocation5 + $0x20] sm:$0xff]  ;;  %v57_v12 = vld [vmem:[#allocation5 + $0x38] sm:$0xff]  ;;  %v58_v13 = vld [vmem:[#allocation5 + $0x50] sm:$0xff]  ;;  %v987_v14 = vpack.c.bf16 %v44_v9, %v43_v8  ;;  %s1178_s8 = scalar_lea.vmem %s1360_s7, 256  ;;  %p1183_p3 = scmp.lt.s32.totalorder %s1360_s7, %s1360_s7 }
  0x2b   :  { %982 = vmatpush3.bf16.msra.mxu0 %v981_v5  ;;  %v1005_v15 = vpack.c.bf16 %v56_v11, %v55_v10  ;;  %v45_v16 = vld [vmem:[#allocation5 + $0x90] sm:$0xff]  ;;  %v46_v17 = vld [vmem:[#allocation5 + $0xa8] sm:$0xff]  ;;  %v1008_v18 = vpack.c.bf16 %v58_v13, %v57_v12  ;;  %v60_v20 = vld [vmem:[#allocation5 + $0x80] sm:$0xff]  ;;  %p1179_p2 = scmp.ne.s32.totalorder %s1360_s7, %s1178_s8  ;;  %p1184_p4 = scmp.lt.s32.totalorder %s1178_s8, %s1178_s8 }
  0x2c   :  { %983 = vmatprep.subr.bf16.mxu0 %v1210_v0  ;;  %v59_v19 = vld [vmem:[#allocation5 + $0x68] sm:$0xff]  ;;  %v990_v21 = vpack.c.bf16 %v46_v17, %v45_v16  ;;  %v47_v22 = vld [vmem:[#allocation5 + $0xc0] sm:$0xff]  ;;  %v48_v23 = vld [vmem:[#allocation5 + $0xd8] sm:$0xff] }
  0x2d   :  { %1006 = vmatpush3.bf16.msra.mxu1 %v1005_v15  ;;  %v1011_v24 = vpack.c.bf16 %v60_v20, %v59_v19  ;;  %v61_v25 = vld [vmem:[#allocation5 + $0x98] sm:$0xff]  ;;  %v62_v26 = vld [vmem:[#allocation5 + $0xb0] sm:$0xff]  ;;  %v993_v27 = vpack.c.bf16 %v48_v23, %v47_v22  ;;  %v50_v29 = vld [vmem:[#allocation5 + $0x108] sm:$0xff]  ;;  %p1185_p5 = por %p1184_p4, %p1183_p3 }
  0x2e   :  { %1007 = vmatprep.subr.bf16.mxu1 %v1210_v0  ;;  %v49_v28 = vld [vmem:[#allocation5 + $0xf0] sm:$0xff]  ;;  %v1014_v30 = vpack.c.bf16 %v62_v26, %v61_v25  ;;  %v63_v31 = vld [vmem:[#allocation5 + $0xc8] sm:$0xff]  ;;  %v64_v32 = vld [vmem:[#allocation5 + $0xe0] sm:$0xff] }
  0x2f   :  { %985 = vmatpush3.bf16.msra.mxu0 %v984_v7  ;;  %v996_v33 = vpack.c.bf16 %v50_v29, %v49_v28  ;;  %v51_v34 = vld [vmem:[#allocation5 + $0x120] sm:$0xff]  ;;  %v52_v35 = vld [vmem:[#allocation5 + $0x138] sm:$0xff]  ;;  %v1017_v36 = vpack.c.bf16 %v64_v32, %v63_v31  ;;  %v66_v38 = vld [vmem:[#allocation5 + $0x110] sm:$0xff]  ;;  %p1186_p6 = pnand %p1185_p5, %p1179_p2 }
  0x30   :  { %986 = vmatprep.subr.bf16.mxu0 %v1210_v0  ;;  %v65_v37 = vld [vmem:[#allocation5 + $0xf8] sm:$0xff]  ;;  %v999_v39 = vpack.c.bf16 %v52_v35, %v51_v34  ;;  %v53_v40 = vld [vmem:[#allocation5 + $0x150] sm:$0xff]  ;;  %v54_v41 = vld [vmem:[#allocation5 + $0x168] sm:$0xff] }
  0x31   :  { %1009 = vmatpush3.bf16.msra.mxu1 %v1008_v18  ;;  %v1020_v42 = vpack.c.bf16 %v66_v38, %v65_v37  ;;  %v67_v43 = vld [vmem:[#allocation5 + $0x128] sm:$0xff]  ;;  %v68_v44 = vld [vmem:[#allocation5 + $0x140] sm:$0xff]  ;;  %v1002_v45 = vpack.c.bf16 %v54_v41, %v53_v40  ;;  %v38_v47 = vld [vmem:[#allocation2] sm:$0x1] }
  0x32   :  { %1010 = vmatprep.subr.bf16.mxu1 %v1210_v0  ;;  %v1023_v46 = vpack.c.bf16 %v68_v44, %v67_v43  ;;  %v69_v48 = vld [vmem:[#allocation5 + $0x158] sm:$0xff]  ;;  %v70_v49 = vld [vmem:[#allocation5 + $0x170] sm:$0xff]  ;;  %v72_v52 = vld [vmem:[#allocation5 + $0x28] sm:$0xff] }
  0x33   :  { %988 = vmatpush3.bf16.msra.mxu0 %v987_v14  ;;  %v1026_v50 = vpack.c.bf16 %v70_v49, %v69_v48  ;;  %v71_v51 = vld [vmem:[#allocation5 + $0x10] sm:$0xff]  ;;  %v73_v53 = vld [vmem:[#allocation5 + $0x40] sm:$0xff]  ;;  %v74_v55 = vld [vmem:[#allocation5 + $0x58] sm:$0xff] }
  0x34   :  { %989 = vmatprep.subr.bf16.mxu0 %v1210_v0  ;;  %v1029_v54 = vpack.c.bf16 %v72_v52, %v71_v51  ;;  %v1032_v56 = vpack.c.bf16 %v74_v55, %v73_v53  ;;  %v75_v57 = vld [vmem:[#allocation5 + $0x70] sm:$0xff]  ;;  %v76_v58 = vld [vmem:[#allocation5 + $0x88] sm:$0xff]  ;;  %v77_v60 = vld [vmem:[#allocation5 + $0xa0] sm:$0xff] }
  0x35   :  { %1012 = vmatpush3.bf16.msra.mxu1 %v1011_v24  ;;  %v1035_v59 = vpack.c.bf16 %v76_v58, %v75_v57  ;;  %v78_v61 = vld [vmem:[#allocation5 + $0xb8] sm:$0xff]  ;;  %v79_v63 = vld [vmem:[#allocation5 + $0xd0] sm:$0xff]  ;;  %v80_v2 = vld [vmem:[#allocation5 + $0xe8] sm:$0xff] }
  0x36   :  { %1013 = vmatprep.subr.bf16.mxu1 %v1210_v0  ;;  %v1038_v62 = vpack.c.bf16 %v78_v61, %v77_v60  ;;  %v1041_v3 = vpack.c.bf16 %v80_v2, %v79_v63  ;;  %v81_v4 = vld [vmem:[#allocation5 + $0x100] sm:$0xff]  ;;  %v82_v5 = vld [vmem:[#allocation5 + $0x118] sm:$0xff]  ;;  %v83_v7 = vld [vmem:[#allocation5 + $0x130] sm:$0xff] }
  0x37   :  { %991 = vmatpush3.bf16.msra.mxu0 %v990_v21  ;;  %v1044_v6 = vpack.c.bf16 %v82_v5, %v81_v4  ;;  %v84_v8 = vld [vmem:[#allocation5 + $0x148] sm:$0xff]  ;;  %v135_v10 = vld [vmem:[#allocation5 + $0x300] ss:$0 sm:$0xff]  ;;  %v86_v16 = vld [vmem:[#allocation5 + $0x178] sm:$0xff] }
  0x38   :  { %992 = vmatprep.subr.bf16.mxu0 %v1210_v0  ;;  %v1047_v9 = vpack.c.bf16 %v84_v8, %v83_v7  ;;  %v85_v15 = vld [vmem:[#allocation5 + $0x160] sm:$0xff]  ;;  %v88_v18 = vld [vmem:[#allocation5 + $0x188] sm:$0xff]  ;;  %v90_v22 = vld [vmem:[#allocation5 + $0x198] sm:$0xff] }
  0x39   :  { %1015 = vmatpush3.bf16.msra.mxu1 %v1014_v30  ;;  %v1050_v17 = vpack.c.bf16 %v86_v16, %v85_v15  ;;  %v91_v19 = vld [vmem:[#allocation5 + $0x1a0] sm:$0xff]  ;;  %v94_v24 = vld [vmem:[#allocation5 + $0x1b8] sm:$0xff]  ;;  %v97_v25 = vld [vmem:[#allocation5 + $0x1d0] sm:$0xff] }
  0x3a   :  { %1016 = vmatprep.subr.bf16.mxu1 %v1210_v0  ;;  %v87_v20 = vld [vmem:[#allocation5 + $0x180] sm:$0xff]  ;;  %v1052_v21 = vpack.c.bf16 %v91_v19, %v88_v18  ;;  %v93_v26 = vld [vmem:[#allocation5 + $0x1b0] sm:$0xff]  ;;  %v96_v28 = vld [vmem:[#allocation5 + $0x1c8] sm:$0xff] }
  0x3b   :  { %994 = vmatpush3.bf16.msra.mxu0 %v993_v27  ;;  %v1054_v23 = vpack.c.bf16 %v90_v22, %v87_v20  ;;  %v1056_v27 = vpack.c.bf16 %v97_v25, %v94_v24  ;;  %v1058_v29 = vpack.c.bf16 %v96_v28, %v93_v26  ;;  %v100_v30 = vld [vmem:[#allocation5 + $0x1e8] sm:$0xff]  ;;  %v103_v31 = vld [vmem:[#allocation5 + $0x200] sm:$0xff]  ;;  %v102_v34 = vld [vmem:[#allocation5 + $0x1f8] sm:$0xff] }
  0x3c   :  { %995 = vmatprep.subr.bf16.mxu0 %v1210_v0  ;;  %v1060_v32 = vpack.c.bf16 %v103_v31, %v100_v30  ;;  %v109_v37 = vld [vmem:[#allocation5 + $0x230] sm:$0xff]  ;;  %v108_v40 = vld [vmem:[#allocation5 + $0x228] sm:$0xff]  ;;  %v115_v43 = vld [vmem:[#allocation5 + $0x260] sm:$0xff] }
  0x3d   :  { %1018 = vmatpush3.bf16.msra.mxu1 %v1017_v36  ;;  %v106_v36 = vld [vmem:[#allocation5 + $0x218] sm:$0xff]  ;;  %v121_v49 = vld [vmem:[#allocation5 + $0x290] sm:$0xff]  ;;  %v120_v52 = vld [vmem:[#allocation5 + $0x288] sm:$0xff] }
  0x3e   :  { %1019 = vmatprep.subr.bf16.mxu1 %v1210_v0  ;;  %v1064_v38 = vpack.c.bf16 %v109_v37, %v106_v36  ;;  %v118_v48 = vld [vmem:[#allocation5 + $0x278] sm:$0xff]  ;;  %v117_v51 = vld [vmem:[#allocation5 + $0x270] sm:$0xff]  ;;  %v127_v55 = vld [vmem:[#allocation5 + $0x2c0] sm:$0xff] }
  0x3f   :  { %997 = vmatpush3.bf16.msra.mxu0 %v996_v33  ;;  %v99_v33 = vld [vmem:[#allocation5 + $0x1e0] sm:$0xff]  ;;  %v1074_v53 = vpack.c.bf16 %v120_v52, %v117_v51  ;;  %v126_v58 = vld [vmem:[#allocation5 + $0x2b8] sm:$0xff]  ;;  %v133_v61 = vld [vmem:[#allocation5 + $0x2f0] sm:$0xff] }
  0x40   :  { %998 = vmatprep.subr.bf16.mxu0 %v1210_v0  ;;  %v1062_v35 = vpack.c.bf16 %v102_v34, %v99_v33  ;;  %v123_v57 = vld [vmem:[#allocation5 + $0x2a0] sm:$0xff]  ;;  %v130_v60 = vld [vmem:[#allocation5 + $0x2d8] sm:$0xff]  ;;  %v136_v63 = vld [vmem:[#allocation5 + $0x308] ss:$0 sm:$0xff] }
  0x41   :  { %1021 = vmatpush3.bf16.msra.mxu1 %v1020_v42  ;;  %v112_v42 = vld [vmem:[#allocation5 + $0x248] sm:$0xff]  ;;  %v89_v2 = vld [vmem:[#allocation5 + $0x190] sm:$0xff]  ;;  %v107_v15 = vld [vmem:[#allocation5 + $0x220] sm:$0xff] }
  0x42   :  { %1022 = vmatprep.subr.bf16.mxu1 %v1210_v0  ;;  %v1068_v44 = vpack.c.bf16 %v115_v43, %v112_v42  ;;  %v110_v16 = vld [vmem:[#allocation5 + $0x238] sm:$0xff]  ;;  %v113_v18 = vld [vmem:[#allocation5 + $0x250] sm:$0xff]  ;;  %v116_v19 = vld [vmem:[#allocation5 + $0x268] sm:$0xff] }
  0x43   :  { %1000 = vmatpush3.bf16.msra.mxu0 %v999_v39  ;;  %v105_v39 = vld [vmem:[#allocation5 + $0x210] sm:$0xff]  ;;  %v1097_v20 = vpack.c.bf16 %v116_v19, %v113_v18  ;;  %v128_v24 = vld [vmem:[#allocation5 + $0x2c8] sm:$0xff]  ;;  %v131_v28 = vld [vmem:[#allocation5 + $0x2e0] sm:$0xff] }
  0x44   :  { %1001 = vmatprep.subr.bf16.mxu0 %v1210_v0  ;;  %v1066_v41 = vpack.c.bf16 %v108_v40, %v105_v39  ;;  %v129_v26 = vld [vmem:[#allocation5 + $0x2d0] sm:$0xff]  ;;  %v134_v30 = vld [vmem:[#allocation5 + $0x2f8] sm:$0xff] }
  0x45   :  { %1024 = vmatpush3.bf16.msra.mxu1 %v1023_v46  ;;  %v114_v46 = vld [vmem:[#allocation5 + $0x258] sm:$0xff]  ;;  %v1106_v31 = vpack.c.bf16 %v134_v30, %v131_v28 }
  0x46   :  { %1025 = vmatprep.subr.bf16.mxu1 %v1210_v0 }
  0x47   :  { %1003 = vmatpush3.bf16.msra.mxu0 %v1002_v45  ;;  %v111_v45 = vld [vmem:[#allocation5 + $0x240] sm:$0xff] }
  0x48   :  { %1028 = vmatprep.subr.bf16.mxu0 %v1210_v0 }
  0x49   :  { %1027 = vmatpush3.bf16.msra.mxu1 %v1026_v50  ;;  %v1072_v50 = vpack.c.bf16 %v121_v49, %v118_v48 }
  0x4a   :  { %873 = vmatmul.mubr.f32.vlgmr.msra.gmra.mrb[0].mxu0 %v38_v47  ;;  %1053 = vmatprep.subr.bf16.mxu1 %v1052_v21  ;;  %v1070_v47 = vpack.c.bf16 %v114_v46, %v111_v45  ;;  %v122_v21 = vld [vmem:[#allocation5 + $0x298] sm:$0xff] }
  0x4b   :  { %942 = vmatprep.mubr.msk.f32.mxu0 %vm1211_vm0, %v1212_v1  ;;  %1030 = vmatpush3.bf16.msra.mxu0 %v1029_v54  ;;  %v124_v54 = vld [vmem:[#allocation5 + $0x2a8] sm:$0xff] }
  0x4c   :  { %1031 = vmatprep.subr.bf16.mxu0 %v1210_v0 }
  0x4f   :  { %1033 = vmatpush3.bf16.msra.mxu0 %v1032_v56  ;;  %v1076_v56 = vpack.c.bf16 %v127_v55, %v124_v54 }
  0x50   :  { %1034 = vmatprep.subr.bf16.mxu0 %v1210_v0 }
  0x53   :  { %1036 = vmatpush3.bf16.msra.mxu0 %v1035_v59  ;;  %v1078_v59 = vpack.c.bf16 %v126_v58, %v123_v57 }
  0x54   :  { %1037 = vmatprep.subr.bf16.mxu0 %v1210_v0 }
  0x57   :  { %1039 = vmatpush3.bf16.msra.mxu0 %v1038_v62  ;;  %v1080_v62 = vpack.c.bf16 %v133_v61, %v130_v60 }
  0x58   :  { %1040 = vmatprep.subr.bf16.mxu0 %v1210_v0 }
  0x5b   :  { %1042 = vmatpush3.bf16.msra.mxu0 %v1041_v3  ;;  %v92_v3 = vld [vmem:[#allocation5 + $0x1a8] sm:$0xff] }
  0x5c   :  { %1043 = vmatprep.subr.bf16.mxu0 %v1210_v0  ;;  %v1085_v7 = vpack.c.bf16 %v92_v3, %v89_v2  ;;  %v1214_v3 = vmov 2475754826  }
  0x5f   :  { %1045 = vmatpush3.bf16.msra.mxu0 %v1044_v6 }
  0x60   :  { %1046 = vmatprep.subr.bf16.mxu0 %v1210_v0 }
  0x63   :  { %1048 = vmatpush3.bf16.msra.mxu0 %v1047_v9  ;;  %v95_v9 = vld [vmem:[#allocation5 + $0x1c0] sm:$0xff] }
  0x64   :  { %1049 = vmatprep.subr.bf16.mxu0 %v1210_v0 }
  0x67   :  { %1051 = vmatpush3.bf16.msra.mxu0 %v1050_v17  ;;  %v1094_v17 = vpack.c.bf16 %v110_v16, %v107_v15  ;;  %v1218_v15 = vmov 1326507024  }
  0x68   :  { %1084 = vmatprep.subr.bf16.mxu0 %v1210_v0 }
 0x11d   :  { %v204_v11 = vpop.f32.mrb[0].mxu0 }
 0x11e   :  { %v205_v12 = vadd.f32 %v204_v11, %v135_v10  ;;  %v874_v13 = vpop.f32.mrb[1].mxu0  ;;  %v98_v10 = vld [vmem:[#allocation5 + $0x1d8] sm:$0xff] }
 0x11f   :  { %v1088_v11 = vpack.c.bf16 %v98_v10, %v95_v9  ;;  %v104_v13 = vld [vmem:[#allocation5 + $0x208] sm:$0xff]  ;;  %v1216_v9 = vmov 2102212464  }
 0x120   :  { %v208_v14 = vmax.f32 %v205_v12, 0.0  ;;  %v101_v12 = vld [vmem:[#allocation5 + $0x1f0] sm:$0xff] }
 0x122   :  { %908 = vmatmul.mubr.f32.vlgmr.msra.gmra.mrb[0].mxu1 %v208_v14  ;;  %v1091_v14 = vpack.c.bf16 %v104_v13, %v101_v12  ;;  %v1217_v12 = vmov 920167782  }
 0x123   :  { %414 = vmatprep.mubr.f32.mxu1 %v1212_v1  ;;  %1055 = vmatpush1.bf16.msra.mxu1 %v1054_v23  ;;  %v125_v23 = vld [vmem:[#allocation5 + $0x2b0] sm:$0xff] }
 0x124   :  { %1057 = vmatprep.subr.bf16.mxu1 %v1056_v27  ;;  %v1103_v25 = vpack.c.bf16 %v128_v24, %v125_v23  ;;  %v132_v27 = vld [vmem:[#allocation5 + $0x2e8] sm:$0xff] }
 0x127   :  { %1059 = vmatpush1.bf16.msra.mxu1 %v1058_v29  ;;  %v1082_v29 = vpack.c.bf16 %v132_v27, %v129_v26 }
 0x128   :  { %1061 = vmatprep.subr.bf16.mxu1 %v1060_v32  ;;  %v137_v32 = vld [vmem:[#allocation5 + $0x310] ss:$0 sm:$0xff] }
 0x12b   :  { %1063 = vmatpush1.bf16.msra.mxu1 %v1062_v35 }
 0x12c   :  { %1065 = vmatprep.subr.bf16.mxu1 %v1064_v38 }
 0x12f   :  { %1067 = vmatpush1.bf16.msra.mxu1 %v1066_v41 }
 0x130   :  { %1069 = vmatprep.subr.bf16.mxu1 %v1068_v44 }
 0x133   :  { %1071 = vmatpush1.bf16.msra.mxu1 %v1070_v47 }
 0x134   :  { %1073 = vmatprep.subr.bf16.mxu1 %v1072_v50 }
 0x137   :  { %1075 = vmatpush1.bf16.msra.mxu1 %v1074_v53 }
 0x138   :  { %1077 = vmatprep.subr.bf16.mxu1 %v1076_v56 }
 0x13b   :  { %1079 = vmatpush1.bf16.msra.mxu1 %v1078_v59 }
 0x13c   :  { %1081 = vmatprep.subr.bf16.mxu1 %v1080_v62 }
 0x13f   :  { %1083 = vmatpush1.bf16.msra.mxu1 %v1082_v29 }
 0x1f5   :  { %v275_v4 = vpop.f32.mrb[0].mxu1 }
 0x1f6   :  { %v276_v5 = vadd.f32 %v275_v4, %v136_v63  ;;  %v909_v6 = vpop.f32.mrb[1].mxu1  ;;  %v1213_v63 = vmov 683565275  }
 0x1f7   :  { %v1215_v6 = vmov 2131351028  }
 0x1f8   :  { %v279_v8 = vmax.f32 %v276_v5, 0.0 }
 0x1fa   :  { %943 = vmatmul.mubr.f32.vlgmr.msra.gmra.mrb[2].mxu0 %v279_v8 }
 0x1fb   :  { %1086 = vmatpush3.bf16.msra.mxu0 %v1085_v7  ;;  %977 = vmatprep.mubr.msk.f32.mxu0 %vm1211_vm0, %v1212_v1  ;;  %v119_v1 = vld [vmem:[#allocation5 + $0x280] sm:$0xff] }
 0x1fc   :  { %1087 = vmatprep.subr.bf16.mxu0 %v1210_v0  ;;  %v1100_v22 = vpack.c.bf16 %v122_v21, %v119_v1 }
 0x1ff   :  { %1089 = vmatpush3.bf16.msra.mxu0 %v1088_v11 }
 0x200   :  { %1090 = vmatprep.subr.bf16.mxu0 %v1210_v0 }
 0x203   :  { %1092 = vmatpush3.bf16.msra.mxu0 %v1091_v14 }
 0x204   :  { %1093 = vmatprep.subr.bf16.mxu0 %v1210_v0 }
 0x207   :  { %1095 = vmatpush3.bf16.msra.mxu0 %v1094_v17 }
 0x208   :  { %1096 = vmatprep.subr.bf16.mxu0 %v1210_v0 }
 0x20b   :  { %1098 = vmatpush3.bf16.msra.mxu0 %v1097_v20 }
 0x20c   :  { %1099 = vmatprep.subr.bf16.mxu0 %v1210_v0 }
 0x20f   :  { %1101 = vmatpush3.bf16.msra.mxu0 %v1100_v22 }
 0x210   :  { %1102 = vmatprep.subr.bf16.mxu0 %v1210_v0 }
 0x213   :  { %1104 = vmatpush3.bf16.msra.mxu0 %v1103_v25 }
 0x214   :  { %1105 = vmatprep.subr.bf16.mxu0 %v1210_v0 }
 0x217   :  { %1107 = vmatpush3.bf16.msra.mxu0 %v1106_v31 }
 0x2cd   :  { %v346_v33 = vpop.f32.mrb[2].mxu0 }
 0x2ce   :  { %v347_v34 = vadd.f32 %v346_v33, %v137_v32  ;;  %v944_v35 = vpop.f32.mrb[3].mxu0 }
 0x2d0   :  { %415 = vmatmul.mubr.f32.vlgmr.msra.gmra.mrb[2].mxu1 %v347_v34  ;;  %978 = vmatmul.mubr.f32.vlgmr.msra.gmra.mrb[4].mxu0 %v347_v34 }
 0x3a3   :  { %v416_v36 = vpop.f32.mrb[2].mxu1  ;;  %v487_v37 = vpop.f32.mrb[4].mxu0 }
 0x3a4   :  { %v491_v38 = vmul.f32 %v416_v36, %v416_v36  ;;  %v418_v39 = vpop.f32.mrb[3].mxu1  ;;  %v979_v40 = vpop.f32.mrb[5].mxu0  ;;  %v495_v42 = vmul.f32 %v487_v37, %v487_v37 }
 0x3a5   :  { %v493_v0 = vmul.f32 %v418_v39, %v418_v39 }
 0x3a6   :  { %v492_v41 = vadd.f32 1e-05, %v491_v38 }
 0x3a8   :  { %v494_v43 = vadd.f32 %v493_v0, %v492_v41 }
 0x3aa   :  { %v496_v44 = vadd.f32 %v495_v42, %v494_v43 }
 0x3ac   :  { %1128 = vrsqrt.f32 %v496_v44 }
 0x3b6   :  { %v1129_v45 = vpop.eup %1128 }
 0x3b7   :  { %v1309_v46 = vmul.f32 %v1129_v45, %v496_v44  ;;  %v1311_v47 = vmul.f32 %v1129_v45, %v416_v36  ;;  %v1313_v48 = vmul.f32 %v1129_v45, %v418_v39  ;;  %v1315_v49 = vmul.f32 %v1129_v45, %v487_v37 }
 0x3b9   :  { %v505_v50 = vand.u32 2139095040, %v1309_v46  ;;  %v1320_v51 = vmul.f32 %v1313_v48, %v1311_v47  ;;  %v1324_v52 = vmul.f32 %v1315_v49, %v1311_v47  ;;  %v1328_v53 = vmul.f32 %v1315_v49, %v1313_v48 }
 0x3ba   :  { %v502_v57 = vand.u32 2147483647, %v1309_v46  ;;  %vm504_vm8 = vcmp.lt.s32.totalorder %v1309_v46, 0  ;;  %vm594_vm0 = vweird.f32 %v1309_v46 }
 0x3bb   :  { %v506_v54 = vshrl.u32 %v505_v50, 23 }
 0x3bc   :  { %v509_v60 = vand.u32 8388607, %v502_v57  ;;  %vm503_vm9 = vcmp.le.f32.partialorder %v502_v57, 0.7853982 }
 0x3bd   :  { %v764_v55 = vadd.s32 4294967169, %v506_v54 }
 0x3be   :  { %v510_v17 = vor.u32 8388608, %v509_v60 }
 0x3bf   :  { %v512_v56 = vadd.s32 1, %v764_v55 }
 0x3c0   :  { %v550_v30 = vshll.u32 %v510_v17, 8 }
 0x3c1   :  { %vm513_vm1 = vcmp.gt.s32.totalorder %v512_v56, 0 }
 0x3c2   :  { %v514_v58 = vsel %vm513_vm1, %v512_v56, 0 }
 0x3c3   :  { %v516_v59 = vand.u32 31, %v514_v58  ;;  %v515_v62 = vshrl.u32 %v514_v58, 5 }
 0x3c5   :  { %v517_v61 = vsub.s32 32, %v516_v59  ;;  %v519_v2 = vshll.u32 %v1213_v63, %v516_v59  ;;  %v522_v4 = vshll.u32 %v1214_v3, %v516_v59  ;;  %v525_v8 = vshll.u32 %v1215_v6, %v516_v59 }
 0x3c6   :  { %v528_v11 = vshll.u32 %v1216_v9, %v516_v59  ;;  %v531_v14 = vshll.u32 %v1217_v12, %v516_v59  ;;  %vm534_vm2 = vcmp.lt.s32.totalorder %v515_v62, 1  ;;  %vm537_vm3 = vcmp.lt.s32.totalorder %v515_v62, 4 }
 0x3c7   :  { %v520_v5 = vshrl.u32 %v1214_v3, %v517_v61  ;;  %v523_v7 = vshrl.u32 %v1215_v6, %v517_v61  ;;  %v526_v10 = vshrl.u32 %v1216_v9, %v517_v61  ;;  %v529_v13 = vshrl.u32 %v1217_v12, %v517_v61 }
 0x3c8   :  { %v532_v16 = vshrl.u32 %v1218_v15, %v517_v61  ;;  %v518_v25 = vshrl.u32 %v1213_v63, %v517_v61  ;;  %vm536_vm4 = vcmp.lt.s32.totalorder %v515_v62, 3  ;;  %vm535_vm5 = vcmp.lt.s32.totalorder %v515_v62, 2 }
 0x3c9   :  { %v521_v18 = vor.u32 %v520_v5, %v519_v2  ;;  %v524_v19 = vor.u32 %v523_v7, %v522_v4  ;;  %v527_v20 = vor.u32 %v526_v10, %v525_v8  ;;  %v530_v1 = vor.u32 %v529_v13, %v528_v11 }
 0x3ca   :  { %v533_v21 = vor.u32 %v532_v16, %v531_v14 }
 0x3cb   :  { %v539_v22 = vsel %vm537_vm3, %v527_v20, 2102212464  ;;  %v542_v23 = vsel %vm534_vm2, %v521_v18, %v524_v19  ;;  %v546_v24 = vsel %vm534_vm2, %v524_v19, %v527_v20  ;;  %v543_v26 = vsel %vm537_vm3, %v530_v1, 920167782 }
 0x3cc   :  { %v547_v27 = vsel %vm537_vm3, %v533_v21, 1326507024  ;;  %v544_v28 = vsel %vm536_vm4, %v527_v20, %v543_v26  ;;  %v538_v31 = vsel %vm534_vm2, %v518_v25, %v521_v18  ;;  %v540_v32 = vsel %vm536_vm4, %v524_v19, %v539_v22 }
 0x3cd   :  { %v548_v29 = vsel %vm536_vm4, %v530_v1, %v547_v27  ;;  %v545_v33 = vsel %vm535_vm5, %v542_v23, %v544_v28  ;;  %v541_v39 = vsel %vm535_vm5, %v538_v31, %v540_v32  ;;  %v719_v21 = vmul.f32 %v1311_v47, %v1311_v47 }
 0x3ce   :  { %v549_v34 = vsel %vm535_vm5, %v546_v24, %v548_v29  ;;  %v1336_v37 = vmul.u32.u64.low %v550_v30, %v545_v33  ;;  %v1337_v38 = vmul.u32.u64.high %v550_v30, %v545_v33, %v1336_v37  ;;  %v557_v0 = vmul.u32 %v550_v30, %v541_v39 }
 0x3cf   :  { %v1333_v35 = vmul.u32.u64.low %v550_v30, %v549_v34  ;;  %v1334_v36 = vmul.u32.u64.high %v550_v30, %v549_v34, %v1333_v35  ;;  %v730_v22 = vmul.f32 %v1313_v48, %v1313_v48  ;;  %v741_v23 = vmul.f32 %v1315_v49, %v1315_v49 }
 0x3d0   :  { %v560_v40 = vadd.s32 1, %v1337_v38  ;;  %v720_v30 = vsub.f32 1.0, %v719_v21 }
 0x3d1   :  { %vm559_vm6 = vc.u32 %v1334_v36, %v1336_v37  ;;  %v558_v60 = vadd.s32 %v1336_v37, %v1334_v36  ;;  %v731_v33 = vsub.f32 1.0, %v730_v22  ;;  %v742_v34 = vsub.f32 1.0, %v741_v23 }
 0x3d2   :  { %v561_v41 = vsel %vm559_vm6, %v560_v40, %v1337_v38 }
 0x3d3   :  { %v562_v42 = vadd.s32 %v561_v41, %v557_v0 }
 0x3d5   :  { %v563_v43 = vadd.s32 536870912, %v562_v42 }
 0x3d7   :  { %v564_v44 = vshrl.u32 %v563_v43, 30 }
 0x3d9   :  { %v565_v45 = vshll.u32 %v564_v44, 30  ;;  %v588_v10 = vsub.s32 4, %v564_v44 }
 0x3db   :  { %v566_v50 = vsub.s32 %v562_v42, %v565_v45  ;;  %v589_v13 = vsel %vm504_vm8, %v588_v10, %v564_v44 }
 0x3dc   :  { %v591_v15 = vsel %vm503_vm9, 0, %v589_v13 }
 0x3dd   :  { %v568_v54 = vsub.s32 0, %v566_v50  ;;  %v698_v16 = vadd.s32 3, %v591_v15  ;;  %v595_v17 = vand.u32 3, %v591_v15 }
 0x3df   :  { %v765_v55 = vmin.u32 %v568_v54, %v566_v50  ;;  %v699_v18 = vand.u32 3, %v698_v16  ;;  %vm600_vm10 = vcmp.eq.s32.totalorder %v595_v17, 2  ;;  %vm597_vm12 = vcmp.eq.s32.totalorder %v595_v17, 0 }
 0x3e0   :  { %vm596_vm14 = vcmp.lt.s32.totalorder %v595_v17, 2 }
 0x3e1   :  { %v570_v56 = vclz %v765_v55  ;;  %vm704_vm11 = vcmp.eq.s32.totalorder %v699_v18, 2  ;;  %vm701_vm13 = vcmp.eq.s32.totalorder %v699_v18, 0  ;;  %vm700_vm15 = vcmp.lt.s32.totalorder %v699_v18, 2 }
 0x3e3   :  { %v766_v58 = vadd.s32 4294967294, %v570_v56 }
 0x3e5   :  { %vm767_vm7 = vcmp.lt.s32.totalorder %v766_v58, 0 }
 0x3e6   :  { %v573_v59 = vsel %vm767_vm7, 0, %v766_v58 }
 0x3e7   :  { %v574_v61 = vsub.s32 32, %v573_v59  ;;  %v578_v62 = vsub.s32 4294967266, %v573_v59  ;;  %v575_v63 = vshll.u32 %v566_v50, %v573_v59 }
 0x3e9   :  { %v576_v2 = vshrl.u32 %v558_v60, %v574_v61  ;;  %v579_v3 = vadd.s32 127, %v578_v62 }
 0x3eb   :  { %v577_v4 = vor.u32 %v576_v2, %v575_v63  ;;  %v580_v5 = vshll.u32 %v579_v3, 23 }
 0x3ed   :  { %v581_v6 = vor.u32 4788187, %v580_v5  ;;  %v584_v8 = vcvt.s32.f32 %v577_v4 }
 0x3ef   :  { %v582_v7 = vand.u32 2147483647, %v581_v6 }
 0x3f1   :  { %v585_v9 = vmul.f32 %v584_v8, %v582_v7 }
 0x3f3   :  { %v586_v11 = vxor.u32 2147483648, %v585_v9 }
 0x3f5   :  { %v587_v12 = vsel %vm504_vm8, %v586_v11, %v585_v9 }
 0x3f6   :  { %v590_v14 = vsel %vm503_vm9, %v1309_v46, %v587_v12 }
 0x3f7   :  { %1130 = vcosq.f32 %v590_v14 }
 0x3f8   :  { %1132 = vsinq.f32 %v590_v14 }
 0x401   :  { %v1131_v19 = vpop.eup %1130 }
 0x402   :  { %v1133_v20 = vpop.eup %1132  ;;  %v601_v1 = vxor.u32 2147483648, %v1131_v19 }
 0x403   :  { %v598_v57 = vxor.u32 2147483648, %v1133_v20 }
 0x404   :  { %v602_v24 = vsel %vm600_vm10, %v601_v1, %v1133_v20  ;;  %v706_v25 = vsel %vm704_vm11, %v601_v1, %v1133_v20 }
 0x405   :  { %v599_v26 = vsel %vm597_vm12, %v1131_v19, %v598_v57  ;;  %v703_v27 = vsel %vm701_vm13, %v1131_v19, %v598_v57 }
 0x406   :  { %v603_v28 = vsel %vm596_vm14, %v599_v26, %v602_v24  ;;  %v707_v29 = vsel %vm700_vm15, %v703_v27, %v706_v25 }
 0x407   :  { %v604_v31 = vsel %vm594_vm0, nan, %v603_v28  ;;  %v708_v32 = vsel %vm594_vm0, nan, %v707_v29 }
 0x408   :  { %v709_v35 = vsub.f32 1.0, %v604_v31  ;;  %v716_v36 = vmul.f32 %v708_v32, %v1311_v47  ;;  %v717_v37 = vmul.f32 %v708_v32, %v1313_v48  ;;  %v718_v38 = vmul.f32 %v708_v32, %v1315_v49 }
 0x409   :  { %v721_v39 = vmul.f32 %v720_v30, %v604_v31  ;;  %v732_v40 = vmul.f32 %v731_v33, %v604_v31  ;;  %v743_v0 = vmul.f32 %v742_v34, %v604_v31 }
 0x40a   :  { %v711_v46 = vmul.f32 %v1320_v51, %v709_v35  ;;  %v713_v41 = vmul.f32 %v1324_v52, %v709_v35  ;;  %v715_v42 = vmul.f32 %v1328_v53, %v709_v35 }
 0x40b   :  { %v722_v43 = vadd.f32 %v721_v39, %v719_v21  ;;  %v733_v44 = vadd.f32 %v732_v40, %v730_v22  ;;  %v744_v45 = vadd.f32 %v743_v0, %v741_v23 }
 0x40c   :  { %v724_v50 = vsub.f32 %v711_v46, %v718_v38  ;;  %v726_v47 = vadd.f32 %v717_v37, %v713_v41  ;;  %v728_v54 = vadd.f32 %v718_v38, %v711_v46  ;;  %v735_v48 = vsub.f32 %v715_v42, %v716_v36 }
 0x40d   :  { %723 = vst [vmem:[#allocation7] sm:$0x1] %v722_v43  ;;  %734 = vst [vmem:[#allocation7 + $0x4] sm:$0x1] %v733_v44  ;;  %v737_v49 = vsub.f32 %v713_v41, %v717_v37  ;;  %v739_v51 = vadd.f32 %v716_v36, %v715_v42 }
 0x40e   :  { %745 = vst [vmem:[#allocation7 + $0x8] sm:$0x1] %v744_v45  ;;  %725 = vst [vmem:[#allocation7 + $0x1] sm:$0x1] %v724_v50 }
 0x40f   :  { %727 = vst [vmem:[#allocation7 + $0x2] sm:$0x1] %v726_v47  ;;  %729 = vst [vmem:[#allocation7 + $0x3] sm:$0x1] %v728_v54 }
 0x410   :  { %736 = vst [vmem:[#allocation7 + $0x5] sm:$0x1] %v735_v48  ;;  %738 = vst [vmem:[#allocation7 + $0x6] sm:$0x1] %v737_v49 }
 0x411   :  { %740 = vst [vmem:[#allocation7 + $0x7] sm:$0x1] %v739_v51 }
 0x412   :  { %1189 = shalt.err (!%p1186_p6)
}
 0x413   :  { %s1190_s11 = scalar_lea.hbm %s1381_s2, 256 }
 0x414   :  { %p1191_p7 = scmp.ne.s32.totalorder %s1381_s2, %s1190_s11  ;;  %p1194_p8 = scmp.lt.u32.totalorder %s1190_s11, %s1381_s2 }
 0x416   :  { %p1196_p9 = pnand %p1194_p8, %p1191_p7 }
 0x418   :  { %1199 = shalt.err (!%p1196_p9)
}
 0x419   :  { %s1220_s16 = smov 128   ;;  %s1221_s17 = smov 8  }
 0x41a   :  { %757 = dma.vmem_to_hbm [thread:$0]  %s1360_s7, 256, %s1381_s2, [#allocation4], %s1220_s16, %s1220_s16, %s1221_s17  }
 0x41b   :  { %1204 = dma.done.wait [#allocation4], 256  }
 0x41c   :  { %1205 = vsyncadd [#allocation4], 4294967040 }
 0x41d   :  { %761 = vsyncpa [#allocation3], 1 }
 0x41e   :  { %762 = vsyncpa [#allocation6], 1 }
 0x41f   :  { %763 = vsyncpa [#allocation4], 1 }

</bundles_post_ra>
